<compile_context>
chip_gen: v7x
topology: tpu7x:2x2x1
jax: 0.10.0
libtpu: 0.0.40
codegen_flags: <defaults>
</compile_context>

<pallas_src>
import functools

import jax
import jax.numpy as jnp
from jax.experimental import pallas as pl
from jax.experimental.pallas import tpu as pltpu


def _round_up(n, m):
    return ((n + m - 1) // m) * m


def dense_model_kernel(x_ref, w1_ref, b1_ref, w2_ref, b2_ref, o_ref, *, use_bf16_dots):
    # hidden = sigmoid(x @ W1 + b1)
    # NOTE: for exact f32 parity with the PyTorch reference add
    # precision=jax.lax.Precision.HIGHEST to both dots; default passes atol=1e-5 here.
    x = x_ref[...]
    w1 = w1_ref[...]
    if use_bf16_dots:
        x = x.astype(jnp.bfloat16)
        w1 = w1.astype(jnp.bfloat16)
    h = jnp.dot(x, w1, preferred_element_type=jnp.float32)
    h = jax.nn.sigmoid(h + b1_ref[...])              # b1 is (1, H), broadcasts over rows

    # z = sigmoid(h @ W2 + b2)  -> (tb, 2), values in (0, 1)
    w2 = w2_ref[...]
    if use_bf16_dots:
        h = h.astype(jnp.bfloat16)
        w2 = w2.astype(jnp.bfloat16)
    z = jnp.dot(h, w2, preferred_element_type=jnp.float32)
    z = jax.nn.sigmoid(z + b2_ref[...])              # b2 is (1, 2)

    # Closed-form 2-class log_softmax over dim=1 (pure VPU/EUP, no XLU reduction):
    #   log_softmax(z)[:, 0] = -log(1 + exp(z1 - z0))
    #   log_softmax(z)[:, 1] = -log(1 + exp(z0 - z1))
    # Stable: z in (0, 1) so |z1 - z0| < 1. Columns stored directly (no concat temp).
    d = z[:, 1:2] - z[:, 0:1]
    o_ref[:, 0:1] = (-jnp.log1p(jnp.exp(d))).astype(o_ref.dtype)
    o_ref[:, 1:2] = (-jnp.log1p(jnp.exp(-d))).astype(o_ref.dtype)


def dense_model_forward(x, w1, b1, w2, b2, *, block_b=4096, min_grid_steps=4,
                        use_bf16_dots=False):
    """x: (B, 30) f32; w1: (30, H); b1: (1, H); w2: (H, 2); b2: (1, 2)."""
    B, K = x.shape
    H = w1.shape[1]
    O = w2.shape[1]

    # Batch tile selection:
    #  * multiple of 8 sublanes, capped at the rounded-up batch size,
    #  * capped at block_b (VMEM budget: x + out tiles lane-pad to 128 lanes, so the
    #    double-buffered footprint is ~tb * 2 KiB; tb=4096 -> ~8 MiB, safely under the
    #    default scoped VMEM limit on v5e/v6e/v7x),
    #  * small enough that grid >= min_grid_steps when B allows it, so the batch axis
    #    still shards across both v7x TensorCores and double-buffering stays active.
    tb_full = _round_up(B, 8)
    tb_split = _round_up(pl.cdiv(B, min_grid_steps), 8)
    tb = max(8, min(block_b, tb_split, tb_full))
    grid = (pl.cdiv(B, tb),)

    resident = lambda i: (0, 0)  # weights/biases: same block every step -> stay in VMEM

    kernel = functools.partial(dense_model_kernel, use_bf16_dots=use_bf16_dots)

    return pl.pallas_call(
        kernel,
        out_shape=jax.ShapeDtypeStruct((B, O), jnp.float32),
        grid_spec=pltpu.PrefetchScalarGridSpec(
            num_scalar_prefetch=0,
            grid=grid,
            in_specs=[
                pl.BlockSpec((tb, K), lambda i: (i, 0)),   # x: streamed per batch tile
                pl.BlockSpec((K, H), resident),            # W1 (~4 KB, resident)
                pl.BlockSpec((1, H), resident),            # b1
                pl.BlockSpec((H, O), resident),            # W2
                pl.BlockSpec((1, O), resident),            # b2
            ],
            out_specs=pl.BlockSpec((tb, O), lambda i: (i, 0)),
        ),
        compiler_params=pltpu.CompilerParams(
            dimension_semantics=("parallel",),  # shard batch tiles across TCs on v7x
        ),
    )(x, w1, b1, w2, b2)


def reference_forward(x, w1, b1, w2, b2):
    h = jax.nn.sigmoid(x @ w1 + b1)
    z = jax.nn.sigmoid(h @ w2 + b2)
    return jax.nn.log_softmax(z, axis=1)


if __name__ == "__main__":
    hidden_size = 32
    in_features = 30
    out_features = 2
    batch = 8

    key = jax.random.PRNGKey(0)
    kx, kw1, kb1, kw2, kb2, kx_big = jax.random.split(key, 6)

    x = jax.random.normal(kx, (batch, in_features), dtype=jnp.float32)

    # Deterministic parameter init (PyTorch Linear-like uniform scaling).
    lim1 = 1.0 / jnp.sqrt(in_features)
    w1 = jax.random.uniform(kw1, (in_features, hidden_size), jnp.float32, -lim1, lim1)
    b1 = jax.random.uniform(kb1, (1, hidden_size), jnp.float32, -lim1, lim1)

    lim2 = 1.0 / jnp.sqrt(hidden_size)
    w2 = jax.random.uniform(kw2, (hidden_size, out_features), jnp.float32, -lim2, lim2)
    b2 = jax.random.uniform(kb2, (1, out_features), jnp.float32, -lim2, lim2)

    # Small-batch check (single grid step).
    out = dense_model_forward(x, w1, b1, w2, b2)
    jax.block_until_ready(out)
    ref = reference_forward(x, w1, b1, w2, b2)
    assert out.shape == (batch, out_features)
    assert jnp.allclose(out, ref, atol=1e-5, rtol=1e-5)

    # Larger-batch check exercising the pipelined multi-step grid + a partial final tile.
    big_b = 2050  # tb=520, grid=4, last tile only partially valid
    x_big = jax.random.normal(kx_big, (big_b, in_features), dtype=jnp.float32)
    out_big = dense_model_forward(x_big, w1, b1, w2, b2)
    jax.block_until_ready(out_big)
    ref_big = reference_forward(x_big, w1, b1, w2, b2)
    assert out_big.shape == (big_b, out_features)
    assert jnp.allclose(out_big, ref_big, atol=1e-5, rtol=1e-5)

    # Optional fast path: bf16 MXU inputs with f32 accumulation (relaxed tolerance).
    out_bf16 = dense_model_forward(x_big, w1, b1, w2, b2, use_bf16_dots=True)
    jax.block_until_ready(out_bf16)
    assert jnp.allclose(out_bf16, ref_big, atol=3e-2, rtol=0.0)

    print("KERNEL_OK")
</pallas_src>

<mosaic_0001>
module attributes {stable_mosaic.version = 11 : i64} {
  func.func @dense_model_kernel(%arg0: i32, %arg1: memref<8x30xf32, #tpu.memory_space<vmem>>, %arg2: memref<30x32xf32, #tpu.memory_space<vmem>>, %arg3: memref<1x32xf32, #tpu.memory_space<vmem>>, %arg4: memref<32x2xf32, #tpu.memory_space<vmem>>, %arg5: memref<1x2xf32, #tpu.memory_space<vmem>>, %arg6: memref<8x2xf32, #tpu.memory_space<vmem>>) attributes {dimension_semantics = [#tpu.dimension_semantics<parallel>], iteration_bounds = array<i64: 1>, scalar_prefetch = 0 : i64, scratch_operands = 0 : i64, tpu.core_type = #tpu.core_type<tc>, window_params = [{transform_indices = @transform_0, window_bounds = array<i64: 8, 30>}, {pipeline_mode = #tpu.pipeline_mode<synchronous>, transform_indices = @transform_1, window_bounds = array<i64: 30, 32>}, {pipeline_mode = #tpu.pipeline_mode<synchronous>, transform_indices = @transform_2, window_bounds = array<i64: 1, 32>}, {pipeline_mode = #tpu.pipeline_mode<synchronous>, transform_indices = @transform_3, window_bounds = array<i64: 32, 2>}, {pipeline_mode = #tpu.pipeline_mode<synchronous>, transform_indices = @transform_4, window_bounds = array<i64: 1, 2>}, {transform_indices = @transform_5, window_bounds = array<i64: 8, 2>}]} {
    %c0 = arith.constant 0 : index
    %c0_0 = arith.constant 0 : index
    %0 = vector.load %arg1[%c0, %c0_0] : memref<8x30xf32, #tpu.memory_space<vmem>>, vector<8x30xf32>
    %c0_1 = arith.constant 0 : index
    %c0_2 = arith.constant 0 : index
    %1 = vector.load %arg2[%c0_1, %c0_2] : memref<30x32xf32, #tpu.memory_space<vmem>>, vector<30x32xf32>
    %cst = arith.constant dense<0.000000e+00> : vector<8x32xf32>
    %2 = tpu.matmul %0, %1, %cst {dimension_numbers = #tpu.dot_dimension_numbers<[1], [0], [0], [1], [0, 0, 1, 1], [], []>} : vector<8x30xf32>, vector<30x32xf32>, vector<8x32xf32> -> vector<8x32xf32>
    %c0_3 = arith.constant 0 : index
    %c0_4 = arith.constant 0 : index
    %3 = vector.load %arg3[%c0_3, %c0_4] : memref<1x32xf32, #tpu.memory_space<vmem>>, vector<1x32xf32>
    %4 = vector.broadcast %3 : vector<1x32xf32> to vector<8x32xf32>
    %5 = arith.addf %2, %4 : vector<8x32xf32>
    %6 = arith.negf %5 : vector<8x32xf32>
    %7 = math.exp %6 : vector<8x32xf32>
    %cst_5 = arith.constant 1.000000e+00 : f32
    %8 = vector.broadcast %cst_5 : f32 to vector<8x32xf32>
    %9 = arith.addf %8, %7 : vector<8x32xf32>
    %10 = arith.divf %8, %9 : vector<8x32xf32>
    %c0_6 = arith.constant 0 : index
    %c0_7 = arith.constant 0 : index
    %11 = vector.load %arg4[%c0_6, %c0_7] : memref<32x2xf32, #tpu.memory_space<vmem>>, vector<32x2xf32>
    %cst_8 = arith.constant dense<0.000000e+00> : vector<8x2xf32>
    %12 = tpu.matmul %10, %11, %cst_8 {dimension_numbers = #tpu.dot_dimension_numbers<[1], [0], [0], [1], [0, 0, 1, 1], [], []>} : vector<8x32xf32>, vector<32x2xf32>, vector<8x2xf32> -> vector<8x2xf32>
    %c0_9 = arith.constant 0 : index
    %c0_10 = arith.constant 0 : index
    %13 = vector.load %arg5[%c0_9, %c0_10] : memref<1x2xf32, #tpu.memory_space<vmem>>, vector<1x2xf32>
    %14 = vector.broadcast %13 : vector<1x2xf32> to vector<8x2xf32>
    %15 = arith.addf %12, %14 : vector<8x2xf32>
    %16 = arith.negf %15 : vector<8x2xf32>
    %17 = math.exp %16 : vector<8x2xf32>
    %cst_11 = arith.constant 1.000000e+00 : f32
    %18 = vector.broadcast %cst_11 : f32 to vector<8x2xf32>
    %19 = arith.addf %18, %17 : vector<8x2xf32>
    %20 = arith.divf %18, %19 : vector<8x2xf32>
    %21 = vector.extract_strided_slice %20 {offsets = [0, 1], sizes = [8, 1], strides = [1, 1]} : vector<8x2xf32> to vector<8x1xf32>
    %22 = vector.extract_strided_slice %20 {offsets = [0, 0], sizes = [8, 1], strides = [1, 1]} : vector<8x2xf32> to vector<8x1xf32>
    %23 = arith.subf %21, %22 : vector<8x1xf32>
    %24 = math.exp %23 : vector<8x1xf32>
    %25 = math.log1p %24 : vector<8x1xf32>
    %cst_12 = arith.constant 0.000000e+00 : f32
    %26 = vector.broadcast %cst_12 : f32 to vector<8x1xf32>
    %27 = arith.subf %26, %25 : vector<8x1xf32>
    %c0_13 = arith.constant 0 : index
    %c0_14 = arith.constant 0 : index
    %28 = vector.load %arg6[%c0_13, %c0_14] : memref<8x2xf32, #tpu.memory_space<vmem>>, vector<8x1xf32>
    tpu.vector_store %arg6[%c0_13, %c0_14], %27 {strides = array<i32>} : memref<8x2xf32, #tpu.memory_space<vmem>>, vector<8x1xf32>,
    %cst_15 = arith.constant 0.000000e+00 : f32
    %29 = vector.broadcast %cst_15 : f32 to vector<8x1xf32>
    %30 = arith.subf %29, %23 : vector<8x1xf32>
    %31 = math.exp %30 : vector<8x1xf32>
    %32 = math.log1p %31 : vector<8x1xf32>
    %cst_16 = arith.constant 0.000000e+00 : f32
    %33 = vector.broadcast %cst_16 : f32 to vector<8x1xf32>
    %34 = arith.subf %33, %32 : vector<8x1xf32>
    %c0_17 = arith.constant 0 : index
    %c1 = arith.constant 1 : index
    %35 = vector.load %arg6[%c0_17, %c1] : memref<8x2xf32, #tpu.memory_space<vmem>>, vector<8x1xf32>
    tpu.vector_store %arg6[%c0_17, %c1], %34 {strides = array<i32>} : memref<8x2xf32, #tpu.memory_space<vmem>>, vector<8x1xf32>,
    return
  }
  func.func @transform_0(%arg0: i32) -> (i32, i32) {
    %c0_i32 = arith.constant 0 : i32
    %c0_i32_0 = arith.constant 0 : i32
    return %arg0, %c0_i32 : i32, i32
  }
  func.func @transform_1(%arg0: i32) -> (i32, i32) {
    %c0_i32 = arith.constant 0 : i32
    %c0_i32_0 = arith.constant 0 : i32
    %c0_i32_1 = arith.constant 0 : i32
    return %c0_i32, %c0_i32_0 : i32, i32
  }
  func.func @transform_2(%arg0: i32) -> (i32, i32) {
    %c0_i32 = arith.constant 0 : i32
    %c0_i32_0 = arith.constant 0 : i32
    %c0_i32_1 = arith.constant 0 : i32
    return %c0_i32, %c0_i32_0 : i32, i32
  }
  func.func @transform_3(%arg0: i32) -> (i32, i32) {
    %c0_i32 = arith.constant 0 : i32
    %c0_i32_0 = arith.constant 0 : i32
    %c0_i32_1 = arith.constant 0 : i32
    return %c0_i32, %c0_i32_0 : i32, i32
  }
  func.func @transform_4(%arg0: i32) -> (i32, i32) {
    %c0_i32 = arith.constant 0 : i32
    %c0_i32_0 = arith.constant 0 : i32
    %c0_i32_1 = arith.constant 0 : i32
    return %c0_i32, %c0_i32_0 : i32, i32
  }
  func.func @transform_5(%arg0: i32) -> (i32, i32) {
    %c0_i32 = arith.constant 0 : i32
    %c0_i32_0 = arith.constant 0 : i32
    return %arg0, %c0_i32 : i32, i32
  }
}

</mosaic_0001>

<bundles_post_ra>
// kernel: tpu_custom_call.1
= control target key start
LH: loop header
LB: loop body
LE: loop exit
PB: predicated region body
PF: predicated region fallthrough
CT: control target
= control target key end

     0   :  { %10 = vsyncpa [#allocation3], 0  ;;  %s361_s18 = smov [#allocation2]   ;;  %s446_s0 = inlined_call_operand.hbm [shape: f32[8,30], index: 0, kind: input, shape index: {}]   ;;  %s447_s1 = inlined_call_operand.vmem [shape: f32[30,32], index: 1, kind: input, shape index: {}]   ;;  %s448_s2 = inlined_call_operand.vmem [shape: f32[1,32], index: 2, kind: input, shape index: {}]   ;;  %s449_s3 = inlined_call_operand.vmem [shape: f32[32,2], index: 3, kind: input, shape index: {}]   ;;  %s450_s4 = inlined_call_operand.vmem [shape: f32[1,2], index: 4, kind: input, shape index: {}]   ;;  %s451_s5 = inlined_call_operand.vmem [shape: f32[8,2], index: 5, kind: output, shape index: {}]  }
   0x1   :  { %s17_s19 = sshll.u32 %s361_s18, 4  ;;  %s337_s22 = scalar_lea.hbm %s446_s0, 128  ;;  %s18_s19 = int_to_ptr.vmem [resolvable:$true] %s17_s19 }
   0x2   :  { %p338_p0 = scmp.ne.s32.totalorder %s446_s0, %s337_s22  ;;  %p341_p1 = scmp.lt.u32.totalorder %s337_s22, %s446_s0 }
   0x4   :  { %p343_p2 = pnand %p341_p1, %p338_p0 }
   0x6   :  { %346 = shalt.err (!%p343_p2)
}
   0x7   :  { %s347_s27 = scalar_lea.vmem %s18_s19, 128  ;;  %p352_p4 = scmp.lt.s32.totalorder %s18_s19, %s18_s19 }
   0x8   :  { %p348_p3 = scmp.ne.s32.totalorder %s18_s19, %s347_s27  ;;  %p353_p5 = scmp.lt.s32.totalorder %s347_s27, %s347_s27 }
   0xa   :  { %p354_p6 = por %p353_p5, %p352_p4 }
   0xc   :  { %p355_p7 = pnand %p354_p6, %p348_p3 }
   0xe   :  { %358 = shalt.err (!%p355_p7)
}
   0xf   :  { %20 = dma.hbm_to_vmem [thread:$0]  %s446_s0, 128, %s18_s19, [#allocation3]  }
  0x10   :  { %359 = dma.done.wait [#allocation3], 128  }
  0x11   :  { %360 = vsyncadd [#allocation3], 4294967168  ;;  %v362_v0 = vmov 0.0|0.0   ;;  %vm363_vm0 = vmmov 0   ;;  %v364_v1 = vmov 0.0   ;;  %v33_v2 = vld [vmem:[%s447_s1] sm:$0xff] }
  0x12   :  { %301 = vmatprep.subr.bf16.mxu0 %v362_v0  ;;  %308 = vmatprep.subr.bf16.mxu1 %v362_v0  ;;  %v34_v3 = vld [vmem:[%s447_s1 + $0x8] sm:$0xff]  ;;  %v35_v4 = vld [vmem:[%s447_s1 + $0x10] sm:$0xff]  ;;  %v36_v6 = vld [vmem:[%s447_s1 + $0x18] sm:$0x3f]  ;;  %vm48_vm1 = vcmask 1045504   ;;  %vm365_vm2 = vmmov 1  }
  0x13   :  { %287 = vmatprep.mubr.msk.f32.mxu0 %vm363_vm0, %v364_v1  ;;  %298 = vmatprep.mubr.msk.f32.mxu1 %vm363_vm0, %v364_v1  ;;  %v302_v5 = vpack.c.bf16 %v34_v3, %v33_v2  ;;  %v305_v7 = vpack.c.bf16 %v36_v6, %v35_v4  ;;  %vm306_vm3 = vmpackc.low %vm48_vm1, %vm365_vm2  ;;  %v32_v8 = vld [vmem:[#allocation2] sm:$0xff]  ;;  %vm44_vm4 = vcmask 244736   ;;  %v129_v10 = vld [vmem:[%s449_s3 + $0x8] sm:$0xff]  ;;  %vm139_vm5 = vcmask 261120  }
  0x14   :  { %v128_v9 = vld [vmem:[%s449_s3] sm:$0xff]  ;;  %v130_v11 = vld [vmem:[%s449_s3 + $0x10] sm:$0xff]  ;;  %v131_v13 = vld [vmem:[%s449_s3 + $0x18] sm:$0xff]  ;;  %vm240_vm8 = vcmask 7168   ;;  %vm255_vm9 = vcmask 15368  }
  0x15   :  { %303 = vmatpush3.bf16.msra.mxu0 %v302_v5  ;;  %v309_v12 = vpack.c.bf16 %v129_v10, %v128_v9  ;;  %v312_v14 = vpack.c.bf16 %v131_v13, %v130_v11  ;;  %v262_v15 = vld [vmem:[%s448_s2] ss:$0 sm:$0xff]  ;;  %s366_s2 = smov 1  }
  0x16   :  { %304 = vmatprep.subr.bf16.mxu0 %v362_v0  ;;  %v266_v23 = vld [vmem:[%s450_s4] ss:$0 sm:$0xff]  ;;  %s367_s4 = smov 127  }
  0x17   :  { %310 = vmatpush3.bf16.msra.mxu1 %v309_v12 }
  0x18   :  { %311 = vmatprep.subr.bf16.mxu1 %v362_v0 }
  0x19   :  { %307 = vmatpush3.bf16.msk.msra.mxu0 %vm306_vm3, %v305_v7 }
  0x1b   :  { %313 = vmatpush3.bf16.msra.mxu1 %v312_v14 }
  0x1c   :  { %288 = vmatmul.mubr.msk.f32.vlgmr.msra.gmra.mrb[0].mxu0 %vm44_vm4, %v32_v8 }
  0xef   :  { %v118_v16 = vpop.f32.mrb[0].mxu0 }
  0xf0   :  { %v119_v17 = vadd.f32 %v262_v15, %v118_v16  ;;  %v289_v18 = vpop.f32.mrb[1].mxu0 }
  0xf2   :  { %v265_v19 = vmul.f32 -1.442695, %v119_v17 }
  0xf4   :  { %321 = vpow2.f32 %v265_v19 }
  0xfe   :  { %v322_v20 = vpop.eup %321 }
  0xff   :  { %v125_v21 = vadd.f32 1.0, %v322_v20 }
 0x101   :  { %323 = vrcp.f32 %v125_v21 }
 0x10b   :  { %v324_v22 = vpop.eup %323 }
 0x10c   :  { %299 = vmatmul.mubr.msk.f32.vlgmr.msra.gmra.mrb[0].mxu1 %vm139_vm5, %v324_v22 }
 0x1df   :  { %v209_v24 = vpop.f32.mrb[0].mxu1 }
 0x1e0   :  { %v210_v25 = vadd.f32 %v266_v23, %v209_v24  ;;  %v300_v26 = vpop.f32.mrb[1].mxu1 }
 0x1e2   :  { %v268_v27 = vmul.f32 -1.442695, %v210_v25 }
 0x1e4   :  { %325 = vpow2.f32 %v268_v27 }
 0x1ee   :  { %v326_v28 = vpop.eup %325 }
 0x1ef   :  { %v216_v29 = vadd.f32 1.0, %v326_v28 }
 0x1f1   :  { %327 = vrcp.f32 %v216_v29 }
 0x1fb   :  { %v328_v30 = vpop.eup %327 }
 0x1fc   :  { %220 = vrot.lane.b32.xlu0 %v328_v30, %s366_s2 }
 0x26e   :  { %v221_v31 = vpop.permute.xlu0 %220 }
 0x26f   :  { %v223_v32 = vsub.f32 %v328_v30, %v221_v31 }
 0x271   :  { %v224_v33 = vmul.f32 1.442695, %v223_v32  ;;  %v242_v44 = vsub.f32 0.0, %v223_v32 }
 0x273   :  { %329 = vpow2.f32 %v224_v33  ;;  %v243_v45 = vmul.f32 1.442695, %v242_v44 }
 0x27d   :  { %v330_v34 = vpop.eup %329 }
 0x27e   :  { %v226_v35 = vadd.f32 1.0, %v330_v34  ;;  %v229_v36 = vmul.f32 -0.5, %v330_v34  ;;  %v232_v38 = vand.u32 2147483647, %v330_v34 }
 0x280   :  { %331 = vlog2.f32 %v226_v35  ;;  %v230_v37 = vadd.f32 1.0, %v229_v36  ;;  %vm233_vm6 = vcmp.lt.f32.partialorder %v232_v38, 0.0004427343 }
 0x281   :  { %333 = vpow2.f32 %v243_v45 }
 0x282   :  { %v231_v41 = vmul.f32 %v330_v34, %v230_v37 }
 0x28a   :  { %v332_v39 = vpop.eup %331 }
 0x28b   :  { %v228_v40 = vmul.f32 0.6931472, %v332_v39  ;;  %v334_v46 = vpop.eup %333 }
 0x28c   :  { %v245_v47 = vadd.f32 1.0, %v334_v46  ;;  %v248_v48 = vmul.f32 -0.5, %v334_v46  ;;  %v251_v51 = vand.u32 2147483647, %v334_v46 }
 0x28d   :  { %v234_v42 = vsel %vm233_vm6, %v231_v41, %v228_v40 }
 0x28e   :  { %v235_v43 = vsub.f32 0.0, %v234_v42  ;;  %335 = vlog2.f32 %v245_v47  ;;  %v249_v50 = vadd.f32 1.0, %v248_v48  ;;  %vm252_vm7 = vcmp.lt.f32.partialorder %v251_v51, 0.0004427343 }
 0x290   :  { %237 = vrot.lane.b32.xlu0 %v235_v43, %s367_s4  ;;  %v250_v53 = vmul.f32 %v334_v46, %v249_v50 }
 0x298   :  { %v336_v49 = vpop.eup %335 }
 0x299   :  { %v247_v52 = vmul.f32 0.6931472, %v336_v49 }
 0x29b   :  { %v253_v54 = vsel %vm252_vm7, %v250_v53, %v247_v52 }
 0x29c   :  { %v254_v55 = vsub.f32 0.0, %v253_v54 }
 0x302   :  { %v238_v56 = vpop.permute.xlu0 %237 }
 0x303   :  { %241 = vst.msk [vmem:[%s451_s5] sm:$0xff] %vm240_vm8, %v238_v56 }
 0x304   :  { %256 = vst.msk [vmem:[%s451_s5] sm:$0xff] %vm255_vm9, %v254_v55 }
 0x305   :  { %261 = vsyncpa [#allocation3], 1 }

</bundles_post_ra>
